<compile_context>
chip_gen: v7x
topology: tpu7x:2x2x1
jax: 0.10.0
libtpu: 0.0.40
codegen_flags: <defaults>
</compile_context>

<pallas_src>
import functools

import jax
import jax.numpy as jnp
from jax import lax
from jax.experimental import pallas as pl
from jax.experimental.pallas import tpu as pltpu


def _round_up(x, m):
    return ((x + m - 1) // m) * m


def _default_vmem_limit():
    # v5e/v6e: 128 MiB physical -> allow ~64 MiB scoped; v7x: 64 MiB physical -> 32 MiB.
    try:
        cap = int(pltpu.get_tpu_info().vmem_capacity_bytes)
        return int(min(96 * 1024 * 1024, max(32 * 1024 * 1024, cap // 2)))
    except Exception:
        return 32 * 1024 * 1024


VMEM_LIMIT_BYTES = _default_vmem_limit()


# --------------------------------------------------------------------------
# Linear projection kernels:  out = x @ W (+ b)   (W already transposed to (in,out))
# --------------------------------------------------------------------------
def _linear_kernel(x_ref, w_ref, o_ref):
    o_ref[...] = jnp.dot(x_ref[...], w_ref[...],
                         preferred_element_type=jnp.float32).astype(o_ref.dtype)


def _linear_bias_kernel(x_ref, w_ref, b_ref, o_ref):
    acc = jnp.dot(x_ref[...], w_ref[...], preferred_element_type=jnp.float32)
    o_ref[...] = (acc + b_ref[...].astype(jnp.float32)).astype(o_ref.dtype)


def pallas_linear(x, w, b=None, *, tile_n=256, tile_d=512, out_dtype=None):
    """x: (N, Din), w: (Din, Dout), b: (Dout,) or None -> (N, Dout)."""
    N, Din = x.shape
    Dout = w.shape[1]
    out_dtype = out_dtype or x.dtype

    # Row tile: large multiple of 8; small problems use the full extent.
    tn = N if N <= tile_n else tile_n
    # Column tile: largest lane-aligned divisor of Dout, else full extent.
    td = Dout
    if Dout > tile_d:
        for cand in (tile_d, 256, 128):
            if Dout % cand == 0:
                td = cand
                break
    grid = (pl.cdiv(N, tn), Dout // td)

    # TODO(synk): for very large Din add a K-reduction grid axis with a f32 VMEM
    #             accumulator so the (Din, td) weight tile never limits VMEM (v7x);
    #             a constant-index weight spec could also be single-buffered there.
    cost = pl.CostEstimate(
        flops=2 * N * Din * Dout,
        transcendentals=0,
        bytes_accessed=int(x.size * x.dtype.itemsize * grid[1]
                           + w.size * w.dtype.itemsize * grid[0]
                           + N * Dout * jnp.dtype(out_dtype).itemsize),
    )

    x_spec = pl.BlockSpec((tn, Din), lambda i, j: (i, 0))
    w_spec = pl.BlockSpec((Din, td), lambda i, j: (0, j))
    out_spec = pl.BlockSpec((tn, td), lambda i, j: (i, j))
    params = pltpu.CompilerParams(
        dimension_semantics=("parallel", "parallel"),
        vmem_limit_bytes=VMEM_LIMIT_BYTES,
    )

    if b is None:   # bias-free specialization: no zero-bias DMA, no add
        return pl.pallas_call(
            _linear_kernel,
            out_shape=jax.ShapeDtypeStruct((N, Dout), out_dtype),
            grid_spec=pltpu.PrefetchScalarGridSpec(
                num_scalar_prefetch=0, grid=grid,
                in_specs=[x_spec, w_spec], out_specs=out_spec),
            compiler_params=params, cost_estimate=cost,
        )(x, w)

    b_spec = pl.BlockSpec((1, td), lambda i, j: (0, j))
    return pl.pallas_call(
        _linear_bias_kernel,
        out_shape=jax.ShapeDtypeStruct((N, Dout), out_dtype),
        grid_spec=pltpu.PrefetchScalarGridSpec(
            num_scalar_prefetch=0, grid=grid,
            in_specs=[x_spec, w_spec, b_spec], out_specs=out_spec),
        compiler_params=params, cost_estimate=cost,
    )(x, w, b.reshape(1, Dout))


# --------------------------------------------------------------------------
# Multi-head attention on the packed QKV layout (flash-style online softmax)
# --------------------------------------------------------------------------
def _mha_packed_kernel(q_ref, k_ref, v_ref, o_ref, m_sc, l_sc, acc_sc, *,
                       heads, dim_head, scale, kv_len, kv_block, mask_kv):
    ki = pl.program_id(2)

    @pl.when(ki == 0)
    def _():
        m_sc[...] = jnp.full_like(m_sc, -jnp.inf)
        l_sc[...] = jnp.zeros_like(l_sc)
        acc_sc[...] = jnp.zeros_like(acc_sc)

    # Softmax scale folded into q: one (bq, H*dh) multiply per step instead of a
    # (bq, bk) multiply per head per kv step.
    q = q_ref[...] * scale          # (bq, H*dh), native dtype -> MXU
    k = k_ref[...]                  # (bk, H*dh)
    v = v_ref[...]                  # (bk, H*dh)

    if mask_kv:
        col = ki * kv_block + lax.broadcasted_iota(jnp.int32, (1, kv_block), 1)
        valid = col < kv_len        # (1, bk): padded kv columns masked out

    for h in range(heads):          # unrolled; all heads share one q/k/v DMA
        sl = slice(h * dim_head, (h + 1) * dim_head)
        s = lax.dot_general(q[:, sl], k[:, sl], (((1,), (1,)), ((), ())),
                            preferred_element_type=jnp.float32)       # (bq, bk)
        if mask_kv:
            s = jnp.where(valid, s, -1e30)

        m_prev = m_sc[h]                                               # (bq, 1)
        m_new = jnp.maximum(m_prev, jnp.max(s, axis=-1, keepdims=True))
        alpha = jnp.exp(m_prev - m_new)
        p = jnp.exp(s - m_new)                                         # (bq, bk)
        l_sc[h] = alpha * l_sc[h] + jnp.sum(p, axis=-1, keepdims=True)
        acc_sc[h] = alpha * acc_sc[h] + jnp.dot(
            p.astype(v.dtype), v[:, sl], preferred_element_type=jnp.float32)
        m_sc[h] = m_new

    @pl.when(ki == pl.num_programs(2) - 1)
    def _():
        # Single lane-dense (bq, H*dh) store, already in 'b n (h d)' layout.
        parts = [acc_sc[h] * pl.reciprocal(l_sc[h], approx=True)
                 for h in range(heads)]
        o_ref[...] = jnp.concatenate(parts, axis=-1).astype(o_ref.dtype)


def pallas_mhsa_packed(qkv, *, heads, dim_head, scale, block_q=256, block_k=512):
    """qkv: (B, S, 3*H*dh) with columns packed as [q | k | v] -> (B, S, H*dh)."""
    B, S, packed = qkv.shape
    inner = heads * dim_head
    assert packed == 3 * inner
    # TODO(synk): inner not a multiple of 128 would need a different column tiling.
    assert inner % 128 == 0, "heads*dim_head must be a multiple of 128"

    # Tile selection + pad-and-mask ragged fallback (never collapses to (S, S) tiles).
    if S <= block_q:
        bq = bk = _round_up(S, 8)
    else:
        bq = block_q
        bk = _round_up(min(block_k, _round_up(S, bq)), bq)
    Sp = _round_up(S, max(bq, bk))
    if Sp != S:
        qkv = jnp.pad(qkv, ((0, 0), (0, Sp - S), (0, 0)))
    mask_kv = Sp != S

    grid = (B, Sp // bq, Sp // bk)
    n_q_tiles = Sp // bq
    isz = qkv.dtype.itemsize
    # q + out read/written once; k and v re-read once per q tile.
    cost = pl.CostEstimate(
        flops=4 * B * heads * Sp * Sp * dim_head,
        transcendentals=B * heads * Sp * Sp,
        bytes_accessed=int(B * Sp * inner * isz * (2 + 2 * n_q_tiles)),
    )

    kernel = functools.partial(
        _mha_packed_kernel, heads=heads, dim_head=dim_head, scale=scale,
        kv_len=S, kv_block=bk, mask_kv=mask_kv)

    out = pl.pallas_call(
        kernel,
        out_shape=jax.ShapeDtypeStruct((B, Sp, inner), qkv.dtype),
        grid_spec=pltpu.PrefetchScalarGridSpec(
            num_scalar_prefetch=0,
            grid=grid,
            in_specs=[
                pl.BlockSpec((None, bq, inner), lambda b, qi, ki: (b, qi, 0)),  # q cols
                pl.BlockSpec((None, bk, inner), lambda b, qi, ki: (b, ki, 1)),  # k cols
                pl.BlockSpec((None, bk, inner), lambda b, qi, ki: (b, ki, 2)),  # v cols
            ],
            out_specs=pl.BlockSpec((None, bq, inner), lambda b, qi, ki: (b, qi, 0)),
            scratch_shapes=[
                pltpu.VMEM((heads, bq, 1), jnp.float32),          # running max
                pltpu.VMEM((heads, bq, 1), jnp.float32),          # running denom
                pltpu.VMEM((heads, bq, dim_head), jnp.float32),   # per-head acc
            ],
        ),
        compiler_params=pltpu.CompilerParams(
            dimension_semantics=("parallel", "parallel", "arbitrary"),
            vmem_limit_bytes=VMEM_LIMIT_BYTES,
        ),
        cost_estimate=cost,
    )(qkv, qkv, qkv)

    return out[:, :S, :] if Sp != S else out


# --------------------------------------------------------------------------
# Full Attention.forward (default path)
# --------------------------------------------------------------------------
def prepare_attention_params(w_q, w_kv, w_o, b_o):
    """Hoisted per-model weight prep (done once, not per forward call)."""
    w_qkv = jnp.concatenate([w_q.T, w_kv.T], axis=1)   # (D, 3*inner), cols = [q|k|v]
    return {"w_qkv": w_qkv, "w_o_t": jnp.asarray(w_o).T, "b_o": b_o}


def attention_forward(x, params, *, heads, dim_head):
    """x: (B, S, D); params from prepare_attention_params."""
    B, S, D = x.shape
    inner = heads * dim_head
    N = B * S
    scale = dim_head ** -0.5

    # Fused lane-dense QKV projection (no bias), then a free reshape to (B, S, 3*inner).
    qkv = pallas_linear(x.reshape(N, D), params["w_qkv"], None)   # (N, 3*inner)
    qkv = qkv.reshape(B, S, 3 * inner)

    # Attention directly on the packed layout: no head transposes, output already
    # in 'b n (h d)' order for to_out.
    o = pallas_mhsa_packed(qkv, heads=heads, dim_head=dim_head, scale=scale)

    out = pallas_linear(o.reshape(N, inner), params["w_o_t"], params["b_o"])  # to_out
    return out.reshape(B, S, D)


# --------------------------------------------------------------------------
# Pure-JAX reference (matches PyTorch Attention default forward)
# --------------------------------------------------------------------------
def attention_ref(x, w_q, w_kv, w_o, b_o, *, heads, dim_head):
    B, S, D = x.shape
    inner = heads * dim_head
    hp = lax.Precision.HIGHEST
    q = jnp.einsum('bsd,ed->bse', x, w_q, precision=hp)
    kv = jnp.einsum('bsd,ed->bse', x, w_kv, precision=hp)
    k, v = kv[..., :inner], kv[..., inner:]

    def to_heads(t):
        return t.reshape(B, S, heads, dim_head).transpose(0, 2, 1, 3)

    q, k, v = map(to_heads, (q, k, v))
    dots = jnp.einsum('bhid,bhjd->bhij', q, k, precision=hp) * dim_head ** (-0.5)
    attn = jax.nn.softmax(dots, axis=-1)
    o = jnp.einsum('bhij,bhjd->bhid', attn, v, precision=hp)
    o = o.transpose(0, 2, 1, 3).reshape(B, S, inner)
    return jnp.einsum('bse,de->bsd', o, w_o, precision=hp) + b_o


if __name__ == "__main__":
    # Small demo shapes consistent with the module defaults (heads=8, dim_head=64).
    B, S, D = 2, 8, 32
    heads, dim_head = 8, 64
    inner = heads * dim_head

    key = jax.random.PRNGKey(0)
    kx, kq, kkv, ko, kb = jax.random.split(key, 5)

    x = jax.random.normal(kx, (B, S, D), dtype=jnp.float32)
    w_q = jax.random.normal(kq, (inner, D), dtype=jnp.float32) / jnp.sqrt(D)
    w_kv = jax.random.normal(kkv, (2 * inner, D), dtype=jnp.float32) / jnp.sqrt(D)
    w_o = jax.random.normal(ko, (D, inner), dtype=jnp.float32) / jnp.sqrt(inner)
    b_o = 0.1 * jax.random.normal(kb, (D,), dtype=jnp.float32)

    params = prepare_attention_params(w_q, w_kv, w_o, b_o)   # hoisted weight prep
    out = attention_forward(x, params, heads=heads, dim_head=dim_head)
    out = jax.block_until_ready(out)

    ref = attention_ref(x, w_q, w_kv, w_o, b_o, heads=heads, dim_head=dim_head)
    assert out.shape == (B, S, D)
    max_err = float(jnp.max(jnp.abs(out - ref)))
    assert jnp.allclose(out, ref, atol=2e-2, rtol=2e-2), \
        f"mismatch vs reference (max abs err {max_err})"

    print("KERNEL_OK")
</pallas_src>

<mosaic_0001>
module attributes {stable_mosaic.version = 11 : i64} {
  func.func @_linear_kernel(%arg0: i32, %arg1: i32, %arg2: memref<16x32xf32, #tpu.memory_space<vmem>>, %arg3: memref<32x512xf32, #tpu.memory_space<vmem>>, %arg4: memref<16x512xf32, #tpu.memory_space<vmem>>) attributes {dimension_semantics = [#tpu.dimension_semantics<parallel>, #tpu.dimension_semantics<parallel>], iteration_bounds = array<i64: 1, 3>, scalar_prefetch = 0 : i64, scratch_operands = 0 : i64, tpu.core_type = #tpu.core_type<tc>, window_params = [{transform_indices = @transform_0, window_bounds = array<i64: 16, 32>}, {transform_indices = @transform_1, window_bounds = array<i64: 32, 512>}, {transform_indices = @transform_2, window_bounds = array<i64: 16, 512>}]} {
    %c0 = arith.constant 0 : index
    %c0_0 = arith.constant 0 : index
    %0 = vector.load %arg2[%c0, %c0_0] : memref<16x32xf32, #tpu.memory_space<vmem>>, vector<16x32xf32>
    %c0_1 = arith.constant 0 : index
    %c0_2 = arith.constant 0 : index
    %1 = vector.load %arg3[%c0_1, %c0_2] : memref<32x512xf32, #tpu.memory_space<vmem>>, vector<32x512xf32>
    %cst = arith.constant dense<0.000000e+00> : vector<16x512xf32>
    %2 = tpu.matmul %0, %1, %cst {dimension_numbers = #tpu.dot_dimension_numbers<[1], [0], [0], [1], [0, 0, 1, 1], [], []>} : vector<16x32xf32>, vector<32x512xf32>, vector<16x512xf32> -> vector<16x512xf32>
    %c0_3 = arith.constant 0 : index
    %c0_4 = arith.constant 0 : index
    %3 = vector.load %arg4[%c0_3, %c0_4] : memref<16x512xf32, #tpu.memory_space<vmem>>, vector<16x512xf32>
    tpu.vector_store %arg4[%c0_3, %c0_4], %2 {strides = array<i32>} : memref<16x512xf32, #tpu.memory_space<vmem>>, vector<16x512xf32>,
    return
  }
  func.func @transform_0(%arg0: i32, %arg1: i32) -> (i32, i32) {
    %c0_i32 = arith.constant 0 : i32
    %c0_i32_0 = arith.constant 0 : i32
    return %arg0, %c0_i32 : i32, i32
  }
  func.func @transform_1(%arg0: i32, %arg1: i32) -> (i32, i32) {
    %c0_i32 = arith.constant 0 : i32
    %c0_i32_0 = arith.constant 0 : i32
    return %c0_i32, %arg1 : i32, i32
  }
  func.func @transform_2(%arg0: i32, %arg1: i32) -> (i32, i32) {
    %c0_i32 = arith.constant 0 : i32
    return %arg0, %arg1 : i32, i32
  }
}

</mosaic_0001>

<bundles_post_ra>
// kernel: tpu_custom_call.1
= control target key start
LH: loop header
LB: loop body
LE: loop exit
PB: predicated region body
PF: predicated region fallthrough
CT: control target
= control target key end

     0   :  { %7 = vsyncpa [#allocation3], 0  ;;  %s1029_s0 = inlined_call_operand.hbm [shape: f32[16,32], index: 0, kind: input, shape index: {}]   ;;  %s1030_s1 = inlined_call_operand.hbm [shape: f32[32,1536], index: 1, kind: input, shape index: {}]   ;;  %s1031_s2 = inlined_call_operand.hbm [shape: f32[16,1536], index: 2, kind: output, shape index: {}]  }
   0x1   :  { %8 = vsyncpa [#allocation6], 0 }
   0x2   :  { %10 = vsyncpa [#allocation6 + $0x1], 0 }
   0x3   :  { %11 = vsyncpa [#allocation4], 0 }
   0x4   :  { %13 = vsyncpa [#allocation4 + $0x1], 0  ;;  %s799_s9 = smov 0   ;;  %s801_s10 = smov 0  }
   0x5   :  { %s803_s11 = smov 0   ;;  %s805_s12 = smov 0  }
   0x6   :  { %s807_s13 = smov 0   ;;  %s809_s14 = smov 0  }
   0x7 LB: > { %s505_s15 = sadd.s32 4294967295, %s770_s14   ;;  %s506_s16 = sadd.s32 4294967294, %s770_s14   ;;  %s770_s14 = sphi %s809_s14, %s19_s14   ;;  %s766_s13 = sphi %s807_s13, %s1056_s13   ;;  %s762_s12 = sphi %s805_s12, %s1055_s12   ;;  %s758_s11 = sphi %s803_s11, %s1054_s11   ;;  %s754_s10 = sphi %s801_s10, %s1053_s10   ;;  %s750_s9 = sphi %s799_s9, %s1052_s9  }
   0x8   : > { %p71_p0 = scmp.ne.s32.totalorder %s758_s11, %s754_s10  ;;  %p72_p1 = scmp.eq.s32.totalorder %s770_s14, 0 }
   0x9   : > { %p77_p2 = scmp.ne.s32.totalorder %s754_s10, %s750_s9  ;;  %p836_p3 = scmp.eq.s32.totalorder %s505_s15, 0 }
   0xa   : > { %p840_p4 = por %p72_p1, %p71_p0  ;;  %p103_p5 = scmp.eq.s32.totalorder %s505_s15, 2 }
   0xb   : > { %s1038_s17 = scalar_select %p836_p3, 1, 0 }
   0xc   : > { %p846_p6 = por %p836_p3, %p77_p2  ;;  %p109_p7 = scmp.eq.s32.totalorder %s506_s16, 2 }
   0xd   : > { %p850_p8 = por %p103_p5, %p71_p0  ;;  %p507_p9 = scmp.ge.s32.totalorder %s770_s14, 1 }
   0xe   : > { %s1040_s19 = scalar_select %p846_p6, 1, 0 }
   0xf   : > { %s1041_s20 = scalar_select %p850_p8, 1, 0 }
  0x10   : > { %p855_p10 = por %p109_p7, %p77_p2  ;;  %p116_p11 = scmp.lt.s32.totalorder %s770_s14, 4 }
  0x11   : > { %s772_s23 = smov [#allocation2]   ;;  %p565_p0 = scmp.lt.s32.totalorder %s770_s14, 3 }
  0x12   : > { %s1042_s21 = scalar_select %p855_p10, 1, 0 }
  0x13   : > { %p860_p12 = pnand %p507_p9, %p116_p11  ;;  %s131_s24 = sshll.u32 %s772_s23, 4  ;;  %s132_s24 = int_to_ptr.vmem [resolvable:$true] %s131_s24 }
  0x14   : > { %p875_p2 = pnand %p565_p0, %p840_p4  ;;  %s28_s27 = sadd.s32 1, %s766_s13 }
  0x15   : > { %s1043_s22 = scalar_select %p860_p12, 1, 0 }
  0x16   : > { %p552_p13 = pneg %p860_p12  ;;  %s626_s30 = scalar_lea.hbm %s1029_s0, 256 }
  0x17   : > { %s1045_s26 = scalar_select %p875_p2, 1, 0 }
  0x18   : > { %p869_p1 = pnand %p552_p13, %p836_p3  ;;  %p627_p5 = scmp.ne.s32.totalorder %s1029_s0, %s626_s30 }
  0x19   : > { %p633_p4 = scmp.lt.u32.totalorder %s626_s30, %s1029_s0 }
  0x1a   : > { %p628_p7 = pneg %p869_p1 }
  0x1c   : > { %p629_p9 = pnand %p628_p7, %p627_p5 }
  0x1e   : > { %p630_p11 = pneg %p629_p9 }
  0x20   : > { %p635_p13 = pnand %p633_p4, %p630_p11 }
  0x22   : > { %638 = shalt.err (!%p635_p13)
}
  0x23   : > { %s639_s7 = scalar_lea.vmem %s132_s24, 256  ;;  %p647_p6 = scmp.lt.s32.totalorder %s132_s24, %s132_s24 }
  0x24   : > { %p640_p0 = scmp.ne.s32.totalorder %s132_s24, %s639_s7  ;;  %p648_p3 = scmp.lt.s32.totalorder %s639_s7, %s639_s7 }
  0x26   : > { %p642_p10 = pnand %p640_p0, %p628_p7  ;;  %p649_p12 = por %p648_p3, %p647_p6 }
  0x28   : > { %p643_p8 = pneg %p642_p10 }
  0x2a   : > { %p650_p2 = pnand %p649_p12, %p643_p8 }
  0x2c   : > { %653 = shalt.err (!%p650_p2)
}
  0x2d   : > { %s773_s8 = smov 128   ;;  %s774_s15 = smov 8  }
  0x2e   : > { %555 = dma.hbm_to_vmem [thread:$0]  (!%p869_p1), %s1029_s0, 256, %s132_s24, [#allocation3], %s773_s8, %s773_s8, %s774_s15  }
  0x2f   : > { %p29_p5 = scmp.ge.s32.totalorder %s28_s27, 3  ;;  %s64_s23 = sadd.s32 1, %s758_s11 }
  0x30   : > { %s145_s28 = sand.u32 1, %s758_s11   ;;  %s526_s3 = sshll.u32 %s766_s13, 9 }
  0x31   : > { %s1058_s27 = smov (%p29_p5, %s28_s27), 0  ;;  %s510_s29 = sshll.u32 %s145_s28, 7 }
  0x32   : > { %s61_s30 = ssub.s32 %s766_s13, %s1058_s27  ;;  %s906_s25 = scalar_lea.hbm %s1030_s1, %s526_s3 }
  0x33   : > { %p62_p3 = scmp.eq.s32.totalorder %s61_s30, 0  ;;  %s149_s24 = scalar_lea.vmem [#allocation5], %s510_s29 }
  0x34   : > { %s156_s6 = sshll.u32 %s149_s24, 4  ;;  %s913_s8 = scalar_lea.sflag [#allocation6], %s145_s28  ;;  %s911_s6 = int_to_ptr.vmem [resolvable:$true] %s156_s6 }
  0x35   : > { %s909_s7 = scalar_select %p62_p3, %s758_s11, %s64_s23  }
  0x36   : > { %s654_s15 = scalar_lea.hbm %s906_s25, 2048  ;;  %p1046_p8 = scmp.ne.s32.totalorder %s1045_s26, 0 }
  0x37   : > { %p655_p6 = scmp.ne.s32.totalorder %s906_s25, %s654_s15  ;;  %s659_s30 = scalar_lea.hbm %s1030_s1, 6144 }
  0x38   : > { %p656_p10 = pneg %p1046_p8  ;;  %p660_p2 = scmp.lt.u32.totalorder %s906_s25, %s1030_s1 }
  0x39   : > { %p661_p7 = scmp.lt.u32.totalorder %s659_s30, %s654_s15  ;;  %p663_p11 = scmp.lt.u32.totalorder %s654_s15, %s906_s25 }
  0x3a   : > { %p657_p12 = pnand %p656_p10, %p655_p6 }
  0x3b   : > { %p662_p9 = por %p661_p7, %p660_p2 }
  0x3c   : > { %p658_p1 = pneg %p657_p12 }
  0x3d   : > { %p664_p4 = por %p663_p11, %p662_p9 }
  0x3f   : > { %p665_p13 = pnand %p664_p4, %p658_p1 }
  0x41   : > { %668 = shalt.err (!%p665_p13)
}
  0x42   : > { %s669_s23 = scalar_lea.vmem %s911_s6, 2048  ;;  %s775_s28 = smov [#allocation5]  }
  0x43   : > { %p670_p0 = scmp.ne.s32.totalorder %s911_s6, %s669_s23  ;;  %s674_s4 = sshll.u32 %s775_s28, 4  ;;  %s675_s4 = int_to_ptr.vmem [resolvable:$false] %s674_s4 }
  0x44   : > { %s676_s5 = scalar_lea.vmem %s675_s4, 4096  ;;  %p677_p6 = scmp.lt.s32.totalorder %s911_s6, %s675_s4 }
  0x45   : > { %p672_p5 = pnand %p670_p0, %p656_p10  ;;  %p678_p12 = scmp.lt.s32.totalorder %s676_s5, %s669_s23 }
  0x47   : > { %p673_p3 = pneg %p672_p5  ;;  %p679_p2 = por %p678_p12, %p677_p6 }
  0x49   : > { %p680_p7 = pnand %p679_p2, %p673_p3 }
  0x4b   : > { %683 = shalt.err (!%p680_p7)
}
  0x4c   : > { %s776_s24 = smov 1536   ;;  %s777_s15 = smov 512  }
  0x4d   : > { %s778_s16 = smov 32   ;;  %p1047_p10 = scmp.ne.s32.totalorder %s1043_s22, 0 }
  0x4e   : > { %559 = dma.hbm_to_vmem [thread:$0]  (!%p1046_p8), %s906_s25, 2048, %s911_s6, %s913_s8, %s776_s24, %s777_s15, %s778_s16  }
  0x4f   : > { %168 = sbr.rel (%p1047_p10) target bundleno = 337 (0x151), region = 28  ;;  %p1048_p1 = scmp.ne.s32.totalorder (!%p1047_p10), %s1038_s17, 0 }
  0x56   : > { %737 = dma.done.wait (%p1048_p1), [#allocation3], 256  }
  0x57   : > { %739 = vsyncadd (%p1048_p1), [#allocation3], 4294967040  ;;  %s948_s18 = sand.u32 1, %s754_s10   ;;  %p1049_p8 = scmp.ne.s32.totalorder %s1040_s19, 0 }
  0x58   : > { %s515_s30 = sshll.u32 %s948_s18, 7  ;;  %s175_s29 = scalar_lea.sflag [#allocation6], %s948_s18 }
  0x59   : > { %s952_s3 = scalar_lea.vmem [#allocation5], %s515_s30 }
  0x5a   : > { %741 = dma.done.wait (%p1049_p8), %s175_s29, 2048  }
  0x5b   : > { %743 = vsyncadd (%p1049_p8), %s175_s29, 4294965248  ;;  %v779_v0 = vmov 0.0   ;;  %v206_v1 = vld [vmem:[%s952_s3 + $0x8] sm:$0xff]  ;;  %v208_v3 = vld [vmem:[%s952_s3 + $0x18] sm:$0xff]  ;;  %vm221_vm0 = vcmask 261120   ;;  %s516_s17 = sshll.u32 %s948_s18, 6 }
  0x5c   : > { %292 = vmatprep.mubr.f32.mxu0 %v779_v0  ;;  %369 = vmatprep.mubr.f32.mxu1 %v779_v0  ;;  %v210_v2 = vld [vmem:[%s952_s3 + $0x28] sm:$0xff]  ;;  %v212_v5 = vld [vmem:[%s952_s3 + $0x38] sm:$0xff]  ;;  %v205_v6 = vld [vmem:[%s952_s3] sm:$0xff]  ;;  %s198_s19 = scalar_lea.vmem [#allocation7], %s516_s17  ;;  %s527_s26 = sshll.u32 %s762_s12, 9 }
  0x5d   : > { %v528_v4 = vpack.c.bf16 %v210_v2, %v206_v1  ;;  %v209_v7 = vld [vmem:[%s952_s3 + $0x20] sm:$0xff]  ;;  %v536_v8 = vpack.c.bf16 %v212_v5, %v208_v3  ;;  %v207_v10 = vld [vmem:[%s952_s3 + $0x10] sm:$0xff]  ;;  %v214_v12 = vld [vmem:[%s952_s3 + $0x48] sm:$0xff]  ;;  %s407_s22 = sshll.u32 %s198_s19, 4  ;;  %s981_s8 = scalar_lea.hbm %s1031_s2, %s527_s26  ;;  %s976_s22 = int_to_ptr.vmem [resolvable:$true] %s407_s22 }
  0x5e   : > { %v530_v9 = vpack.c.bf16 %v209_v7, %v205_v6  ;;  %v211_v11 = vld [vmem:[%s952_s3 + $0x30] sm:$0xff]  ;;  %v218_v14 = vld [vmem:[%s952_s3 + $0x68] sm:$0xff]  ;;  %v216_v15 = vld [vmem:[%s952_s3 + $0x58] sm:$0xff]  ;;  %s391_s12 = scalar_lea.sflag [#allocation4], %s948_s18  ;;  %s684_s23 = scalar_lea.vmem %s976_s22, 1024 }
  0x5f   : > { %529 = vmatprep.subr.bf16.mxu0 %v528_v4  ;;  %v538_v13 = vpack.c.bf16 %v211_v11, %v207_v10  ;;  %v220_v16 = vld [vmem:[%s952_s3 + $0x78] sm:$0xff]  ;;  %537 = vmatprep.subr.bf16.mxu1 %v536_v8  ;;  %v532_v17 = vpack.c.bf16 %v218_v14, %v214_v12  ;;  %v213_v19 = vld [vmem:[%s952_s3 + $0x40] sm:$0xff]  ;;  %v215_v21 = vld [vmem:[%s952_s3 + $0x50] sm:$0xff]  ;;  %p685_p9 = scmp.ne.s32.totalorder %s976_s22, %s684_s23  ;;  %p1050_p11 = scmp.ne.s32.totalorder %s1041_s20, 0 }
  0x60   : > { %531 = vmatpush1.bf16.msra.mxu0 %v530_v9  ;;  %v540_v18 = vpack.c.bf16 %v220_v16, %v216_v15  ;;  %v217_v20 = vld [vmem:[%s952_s3 + $0x60] sm:$0xff]  ;;  %v219_v23 = vld [vmem:[%s952_s3 + $0x70] sm:$0xff]  ;;  %v204_v26 = vld [vmem:[#allocation2 + $0x8] sm:$0xff]  ;;  %s780_s28 = smov [#allocation7]  }
  0x61   : > { %539 = vmatpush1.bf16.msra.mxu1 %v538_v13  ;;  %v534_v22 = vpack.c.bf16 %v217_v20, %v213_v19  ;;  %533 = vmatprep.subr.bf16.mxu0 %v532_v17  ;;  %v542_v24 = vpack.c.bf16 %v219_v23, %v215_v21  ;;  %v203_v25 = vld [vmem:[#allocation2] sm:$0xff]  ;;  %p686_p4 = pnand %p685_p9, %p1050_p11  ;;  %s688_s4 = sshll.u32 %s780_s28, 4  ;;  %s689_s4 = int_to_ptr.vmem [resolvable:$false] %s688_s4 }
  0x62   : > { %541 = vmatprep.subr.bf16.mxu1 %v540_v18  ;;  %s690_s5 = scalar_lea.vmem %s689_s4, 2048  ;;  %p691_p0 = scmp.lt.s32.totalorder %s976_s22, %s689_s4 }
  0x63   : > { %p687_p13 = pneg %p686_p4  ;;  %p692_p5 = scmp.lt.s32.totalorder %s690_s5, %s684_s23 }
  0x64   : > { %535 = vmatpush1.bf16.msra.mxu0 %v534_v22 }
  0x65   : > { %543 = vmatpush1.bf16.msra.mxu1 %v542_v24  ;;  %p693_p3 = por %p692_p5, %p691_p0 }
  0x67   : > { %517 = vmatmul.mubr.msk.f32.vlgmr.msra.gmra.mrb[0].mxu0 %vm221_vm0, %v203_v25  ;;  %p694_p6 = pnand %p693_p3, %p687_p13 }
  0x68   : > { %519 = vmatmul.mubr.msk.f32.vlgmr.msra.gmra.mrb[0].mxu1 %vm221_vm0, %v203_v25  ;;  %298 = vmatprep.mubr.f32.mxu0 %v779_v0 }
  0x69   : > { %375 = vmatprep.mubr.f32.mxu1 %v779_v0 }
  0x6b   : > { %518 = vmatmul.mubr.msk.f32.gmra.mrb[2].mxu0 %vm221_vm0, %v204_v26 }
  0x6c   : > { %520 = vmatmul.mubr.msk.f32.gmra.mrb[2].mxu1 %vm221_vm0, %v204_v26 }
 0x13a   : > { %v294_v27 = vpop.f32.mrb[0].mxu0 }
 0x13b   : > { %382 = vst [vmem:[%s198_s19] sm:$0xff] %v294_v27  ;;  %v371_v28 = vpop.f32.mrb[0].mxu1  ;;  %v296_v29 = vpop.f32.mrb[1].mxu0 }
 0x13c   : > { %384 = vst [vmem:[%s198_s19 + $0x10] sm:$0xff] %v371_v28  ;;  %383 = vst [vmem:[%s198_s19 + $0x8] sm:$0xff] %v296_v29  ;;  %v373_v30 = vpop.f32.mrb[1].mxu1 }
 0x13d   : > { %385 = vst [vmem:[%s198_s19 + $0x18] sm:$0xff] %v373_v30 }
 0x13e   : > { %v300_v31 = vpop.f32.mrb[2].mxu0 }
 0x13f   : > { %386 = vst [vmem:[%s198_s19 + $0x20] sm:$0xff] %v300_v31  ;;  %v377_v32 = vpop.f32.mrb[2].mxu1  ;;  %v302_v33 = vpop.f32.mrb[3].mxu0 }
 0x140   : > { %388 = vst [vmem:[%s198_s19 + $0x30] sm:$0xff] %v377_v32  ;;  %387 = vst [vmem:[%s198_s19 + $0x28] sm:$0xff] %v302_v33  ;;  %v379_v34 = vpop.f32.mrb[3].mxu1 }
 0x141   : > { %389 = vst [vmem:[%s198_s19 + $0x38] sm:$0xff] %v379_v34 }
 0x142   : > { %697 = shalt.err (!%p694_p6)
}
 0x143   : > { %s698_s24 = scalar_lea.hbm %s981_s8, 1024  ;;  %s702_s30 = scalar_lea.hbm %s1031_s2, 3072 }
 0x144   : > { %p699_p12 = scmp.ne.s32.totalorder %s981_s8, %s698_s24  ;;  %p703_p10 = scmp.lt.u32.totalorder %s981_s8, %s1031_s2 }
 0x145   : > { %p704_p1 = scmp.lt.u32.totalorder %s702_s30, %s698_s24  ;;  %p706_p9 = scmp.lt.u32.totalorder %s698_s24, %s981_s8 }
 0x146   : > { %p700_p2 = pnand %p699_p12, %p1050_p11 }
 0x147   : > { %p705_p8 = por %p704_p1, %p703_p10 }
 0x148   : > { %p701_p7 = pneg %p700_p2 }
 0x149   : > { %p707_p4 = por %p706_p9, %p705_p8 }
 0x14b   : > { %p708_p13 = pnand %p707_p4, %p701_p7 }
 0x14d   : > { %711 = shalt.err (!%p708_p13)
}
 0x14e   : > { %s781_s17 = smov 512   ;;  %s782_s19 = smov 1536  }
 0x14f   : > { %s783_s26 = smov 32  }
 0x150   : > { %550 = dma.vmem_to_hbm [thread:$0]  (%p1050_p11), %s976_s22, 1024, %s981_s8, %s391_s12, %s781_s17, %s782_s19, %s783_s26  }
 0x151 PF: > { %p567_p0 = scmp.ge.s32.totalorder %s770_s14, 2  ;;  %s422_s25 = sand.u32 1, %s750_s9  }
 0x152   : > { %p1051_p5 = scmp.ne.s32.totalorder %s1042_s21, 0  ;;  %s423_s6 = scalar_lea.sflag [#allocation4], %s422_s25 }
 0x154   : > { %p561_p3 = pnand %p567_p0, %p1051_p5 }
 0x156   : > { %745 = dma.done.wait (!%p561_p3), %s423_s6, 1024  }
 0x157   : > { %747 = vsyncadd (!%p561_p3), %s423_s6, 4294966272  ;;  %s19_s14 = sadd.s32 1, %s770_s14   ;;  %s1052_s9 = smov %s754_s10 }
 0x158   : > { %p16_p6 = scmp.ge.s32.totalorder %s19_s14, 5   ;;  %s1053_s10 = smov %s758_s11 }
 0x159   : > { %s1054_s11 = smov %s909_s7  ;;  %s1055_s12 = smov %s766_s13 }
 0x15a   : > { %s1056_s13 = smov %s1058_s27  ;;  %18 = sbr.rel (!%p16_p6) target bundleno = 7 (0x7), region = 79 }
 0x161   :  { %428 = vsyncpa [#allocation3], 1 }
 0x162   :  { %430 = vsyncpa [#allocation3 + $0x1], 1 }
 0x163   :  { %431 = vsyncpa [#allocation6], 1 }
 0x164   :  { %433 = vsyncpa [#allocation6 + $0x1], 1 }
 0x165   :  { %434 = vsyncpa [#allocation4], 1 }
 0x166   :  { %436 = vsyncpa [#allocation4 + $0x1], 1 }

</bundles_post_ra>
